<compile_context>
chip_gen: v5e
topology: v5e:2x2
jax: 0.10.0
libtpu: 0.0.40
codegen_flags: <defaults>
</compile_context>

<pallas_src>
import numpy as np
import jax
import jax.numpy as jnp
from jax.experimental import pallas as pl
from jax.experimental.pallas import tpu as pltpu

B = 2            # batch_size
S = 4            # cfg.num_state
T = 8            # cfg.num_time_step
E = 32           # cfg.input_embedding_dim == node_rnn_hdim == linear_input_dim
G = 32           # cfg.message_passing_outdim (must equal E for the residual add)
H = 32           # GRU hidden dim (== node_rnn_hdim)
F = 3            # len(cfg.features)
SERIES_LEN = 8   # cfg.series_length (unused under 'state_only' fusion)
LN_EPS = 1e-6

SB = B * S       # rows per time step, batch-major: row = b*S + s (matches PyTorch)
TS = T * S
H3 = 3 * H

# f32 table-slab row offsets
R_XG = 0                  # rows [0:SB]        xg  (SB, 3H)
R_BHN = SB                # row  SB, cols[0:H] b_hn
R_GAMMA = SB + 1          # row,  cols[0:H]    LayerNorm gamma
R_BETA = SB + 2           # row,  cols[0:H]    LayerNorm beta
R_BHEAD = SB + 3          # row,  cols[0:F]    fused head bias
F_ROWS = 16

# bf16 weight-slab row offsets
W_HGNN = 0                # rows [0:TS]            cols[0:G]  per-step embed @ gnn_w[t].T
W_WI = TS                 # rows [TS:TS+G]         cols[0:3H] GRU W_ih.T (gate order r|z|n)
W_WH = TS + G             # rows [TS+G:TS+2G]      cols[0:3H] GRU W_hh.T
W_HEAD = TS + 2 * G       # rows [.. : ..+S*H]     cols[0:F]  fused node_rnn_fc @ fc head
W_ROWS = TS + 2 * G + S * H


def _sigmoid(x):
    # exp + approx reciprocal both land on the EUP slot (keeps the divide off the VPU).
    return pl.reciprocal(1.0 + jnp.exp(-x), approx=True)


def state_graph_kernel(graphs_ref,   # (T*SB, S)      f32   raw graphs, rows (t, b, s)
                       wslab_ref,    # (W_ROWS, 3H)   bf16  packed MXU weights
                       fslab_ref,    # (F_ROWS, 3H)   f32   packed gate bias / LN / head tables
                       out_ref):     # (B, F)         f32
    f32, bf16 = jnp.float32, jnp.bfloat16

    # ---- static views into the packed slabs (free) ----
    w_i = wslab_ref[W_WI:W_WI + G, :]                          # (G, 3H)
    w_h = wslab_ref[W_WH:W_WH + H, :]                          # (H, 3H)
    w_head = wslab_ref[W_HEAD:W_HEAD + S * H, 0:F]             # (S*H, F)

    xg = fslab_ref[R_XG:R_XG + SB, 0:H3]                       # (SB, 3H)
    b_hn = jnp.broadcast_to(fslab_ref[R_BHN:R_BHN + 1, 0:H], (SB, H))
    gamma = fslab_ref[R_GAMMA:R_GAMMA + 1, 0:H]
    beta = fslab_ref[R_BETA:R_BETA + 1, 0:H]
    b_head = fslab_ref[R_BHEAD:R_BHEAD + 1, 0:F]

    # ---- GNN message passing for all T steps (h-independent, off the serial chain) ----
    # msg[(t,b,s), :] = graphs[t,b,s,:] @ (embed @ gnn_w[t].T); per-step projections of
    # the embedding were precomputed offline into the weight slab.
    msg_parts = []
    for t in range(T):
        g_t = graphs_ref[t * SB:(t + 1) * SB, :].astype(bf16)          # (SB, S)
        hg_t = wslab_ref[W_HGNN + t * S:W_HGNN + (t + 1) * S, 0:G]     # (S, G)
        msg_parts.append(jnp.dot(g_t, hg_t, preferred_element_type=f32))
    msg = jnp.concatenate(msg_parts, axis=0)                           # (T*SB, G)

    # ---- fused, h-independent GRU input-gate projection for all T steps ----
    # embedding residual + folded input biases live in xg (same rows for every t).
    xg_full = jnp.concatenate([xg] * T, axis=0)                        # (T*SB, 3H)
    gate_x = jnp.dot(jnp.maximum(msg, 0.0).astype(bf16), w_i,
                     preferred_element_type=f32) + xg_full             # (T*SB, 3H)

    # ---- GRU recurrence: only h @ W_hh + gate math on the serial chain ----
    gx = gate_x[0:SB, :]                                               # t = 0, h0 = 0
    rz = _sigmoid(gx[:, 0:2 * H])                                      # merged r|z sigmoid
    r = rz[:, 0:H]
    z = rz[:, H:2 * H]
    n = jnp.tanh(gx[:, 2 * H:] + r * b_hn)
    h = (1.0 - z) * n
    for t in range(1, T):                                              # static unrolled
        gx = gate_x[t * SB:(t + 1) * SB, :]
        gh = jnp.dot(h.astype(bf16), w_h, preferred_element_type=f32)  # (SB, 3H)
        rz = _sigmoid(gx[:, 0:2 * H] + gh[:, 0:2 * H])                 # one 64-lane add + EUP
        r = rz[:, 0:H]
        z = rz[:, H:2 * H]
        n = jnp.tanh(gx[:, 2 * H:] + r * (gh[:, 2 * H:] + b_hn))
        h = n + z * (h - n)                                            # == (1-z)*n + z*h

    # ---- LayerNorm(node_rnn_hdim, eps=1e-6) ----
    mean = jnp.mean(h, axis=-1, keepdims=True)
    var = jnp.mean((h - mean) ** 2, axis=-1, keepdims=True)
    ln = (h - mean) * jax.lax.rsqrt(var + LN_EPS) * gamma + beta       # (SB, H)

    # ---- batch-major flatten (B, S*H) entirely in vregs (no VMEM scratch round trip) ----
    flat = jnp.concatenate(
        [jnp.concatenate([ln[b * S + s:b * S + s + 1, :] for s in range(S)], axis=1)
         for b in range(B)],
        axis=0)                                                        # (B, S*H)

    # ---- fused node_rnn_fc + fc ('state_only') head ----
    out_ref[...] = jnp.dot(flat.astype(bf16), w_head,
                           preferred_element_type=f32) + b_head        # (B, F)


def prepare_params(p):
    """One-time, param-only packing (hoisted out of the per-call path)."""
    f32 = jnp.float32
    embed = p["embed"].astype(f32)                                     # (S, E)
    w_ih, w_hh = p["w_ih"], p["w_hh"]                                  # (3H, G), (3H, H)
    b_ih, b_hh = p["b_ih"], p["b_hh"]

    # per-step GNN projection of the (batch-independent) embedded node features:
    # hgnn[t*S + j, :] = embed[j] @ gnn_w[t].T
    hgnn = jnp.einsum("se,tge->tsg", embed, p["gnn_w"]).reshape(TS, G)

    # GRU input projection of the embedding residual + folded biases, per (b, s) row.
    b_fold = jnp.concatenate([b_ih[:2 * H] + b_hh[:2 * H], b_ih[2 * H:]])   # (3H,)
    xg = jnp.tile(embed @ w_ih.T + b_fold[None, :], (B, 1))                 # (B*S, 3H)

    # fused prediction head: fc(node_rnn_fc(x)) == x @ (fca_w.T @ fcb_w.T) + fca_b @ fcb_w.T
    w_head = p["fca_w"].T @ p["fcb_w"].T                                    # (S*H, F)
    b_head = p["fca_b"] @ p["fcb_w"].T                                      # (F,)

    wslab = jnp.zeros((W_ROWS, H3), f32)
    wslab = wslab.at[W_HGNN:W_HGNN + TS, 0:G].set(hgnn)
    wslab = wslab.at[W_WI:W_WI + G, :].set(w_ih.T)
    wslab = wslab.at[W_WH:W_WH + H, :].set(w_hh.T)
    wslab = wslab.at[W_HEAD:W_HEAD + S * H, 0:F].set(w_head)

    fslab = jnp.zeros((F_ROWS, H3), f32)
    fslab = fslab.at[R_XG:R_XG + SB, :].set(xg)
    fslab = fslab.at[R_BHN, 0:H].set(b_hh[2 * H:])          # b_hn
    fslab = fslab.at[R_GAMMA, 0:H].set(p["ln_gamma"])
    fslab = fslab.at[R_BETA, 0:H].set(p["ln_beta"])
    fslab = fslab.at[R_BHEAD, 0:F].set(b_head)
    return wslab.astype(jnp.bfloat16), fslab


@jax.jit
def state_graph_forward(graphs, wslab, fslab, series=None, bins=None):
    """graphs: (T, B, S, S) f32.  series / bins accepted for interface parity; under the
    chosen config ('state_only' fusion, use_all_node=True) they do not affect output."""
    del series, bins
    vmem = pl.BlockSpec(memory_space=pltpu.MemorySpace.VMEM)
    return pl.pallas_call(
        state_graph_kernel,
        out_shape=jax.ShapeDtypeStruct((B, F), jnp.float32),
        in_specs=[vmem, vmem, vmem],
        out_specs=vmem,
    )(graphs.reshape(T * B * S, S).astype(jnp.float32), wslab, fslab)


def reference_forward(graphs, p):
    """Pure-JAX f32 reference mirroring the PyTorch (batch-major) semantics."""
    node_feat = jnp.broadcast_to(p["embed"][None], (B, S, E))   # input_embedding(arange)
    seq = []
    for t in range(T):
        x = node_feat.reshape(B * S, E)
        h = jnp.einsum("bse,ge->bsg", node_feat, p["gnn_w"][t])
        h = jnp.einsum("bij,bjg->big", graphs[t], h).reshape(B * S, G)
        seq.append(jnp.maximum(h, 0.0) + x)
    hid = jnp.zeros((B * S, H), jnp.float32)
    for t in range(T):
        gi = seq[t] @ p["w_ih"].T + p["b_ih"]
        gh = hid @ p["w_hh"].T + p["b_hh"]
        r = jax.nn.sigmoid(gi[:, :H] + gh[:, :H])
        z = jax.nn.sigmoid(gi[:, H:2 * H] + gh[:, H:2 * H])
        n = jnp.tanh(gi[:, 2 * H:] + r * gh[:, 2 * H:])
        hid = (1.0 - z) * n + z * hid
    mean = hid.mean(-1, keepdims=True)
    var = ((hid - mean) ** 2).mean(-1, keepdims=True)
    ln = (hid - mean) / jnp.sqrt(var + LN_EPS) * p["ln_gamma"] + p["ln_beta"]
    flat = ln.reshape(B, S, H).reshape(B, S * H)
    state = flat @ p["fca_w"].T + p["fca_b"]
    return state @ p["fcb_w"].T


if __name__ == "__main__":
    key = jax.random.PRNGKey(0)
    ks = jax.random.split(key, 16)
    params = {
        "embed":    0.1 * jax.random.normal(ks[0], (S, E), jnp.float32),
        "gnn_w":    0.1 * jax.random.normal(ks[1], (T, G, E), jnp.float32),   # per-step Linear(E->G, no bias)
        "w_ih":     0.1 * jax.random.normal(ks[2], (3 * H, G), jnp.float32),  # GRU weight_ih_l0
        "w_hh":     0.1 * jax.random.normal(ks[3], (3 * H, H), jnp.float32),  # GRU weight_hh_l0
        "b_ih":     0.1 * jax.random.normal(ks[4], (3 * H,), jnp.float32),
        "b_hh":     0.1 * jax.random.normal(ks[5], (3 * H,), jnp.float32),
        "ln_gamma": 1.0 + 0.1 * jax.random.normal(ks[6], (H,), jnp.float32),
        "ln_beta":  0.1 * jax.random.normal(ks[7], (H,), jnp.float32),
        "fca_w":    0.1 * jax.random.normal(ks[8], (H, S * H), jnp.float32),  # node_rnn_fc
        "fca_b":    0.1 * jax.random.normal(ks[9], (H,), jnp.float32),
        "fcb_w":    0.1 * jax.random.normal(ks[10], (F, H), jnp.float32),     # fc (state_only, no bias)
    }
    graphs = jax.random.uniform(ks[11], (T, B, S, S), dtype=jnp.float32)
    series = jax.random.normal(ks[12], (B, SERIES_LEN, F), jnp.float32)  # unused under 'state_only'

    # one-time, param-only packing (kept out of the per-call path)
    wslab, fslab = prepare_params(params)

    pred = jax.block_until_ready(state_graph_forward(graphs, wslab, fslab, series=series))
    ref = reference_forward(graphs, params)
    assert pred.shape == (B, F), pred.shape
    max_err = float(np.abs(np.asarray(pred) - np.asarray(ref)).max())
    assert np.allclose(np.asarray(pred), np.asarray(ref), atol=2e-2, rtol=2e-2), max_err
    print("KERNEL_OK")
</pallas_src>

<mosaic_0001>
module attributes {stable_mosaic.version = 11 : i64} {
  func.func @state_graph_kernel(%arg0: memref<64x4xf32, #tpu.memory_space<vmem>>, %arg1: memref<224x96xbf16, #tpu.memory_space<vmem>>, %arg2: memref<16x96xf32, #tpu.memory_space<vmem>>, %arg3: memref<2x3xf32, #tpu.memory_space<vmem>>) attributes {dimension_semantics = [], scalar_prefetch = 0 : i64, scratch_operands = 0 : i64, tpu.core_type = #tpu.core_type<tc>} {
    %c32 = arith.constant 32 : index
    %c0 = arith.constant 0 : index
    %0 = vector.load %arg1[%c32, %c0] : memref<224x96xbf16, #tpu.memory_space<vmem>>, vector<32x96xbf16>
    %c64 = arith.constant 64 : index
    %c0_0 = arith.constant 0 : index
    %1 = vector.load %arg1[%c64, %c0_0] : memref<224x96xbf16, #tpu.memory_space<vmem>>, vector<32x96xbf16>
    %c96 = arith.constant 96 : index
    %c0_1 = arith.constant 0 : index
    %2 = vector.load %arg1[%c96, %c0_1] : memref<224x96xbf16, #tpu.memory_space<vmem>>, vector<128x3xbf16>
    %c0_2 = arith.constant 0 : index
    %c0_3 = arith.constant 0 : index
    %3 = vector.load %arg2[%c0_2, %c0_3] : memref<16x96xf32, #tpu.memory_space<vmem>>, vector<8x96xf32>
    %c8 = arith.constant 8 : index
    %c0_4 = arith.constant 0 : index
    %4 = vector.load %arg2[%c8, %c0_4] : memref<16x96xf32, #tpu.memory_space<vmem>>, vector<1x32xf32>
    %5 = vector.shape_cast %4 : vector<1x32xf32> to vector<1x32xf32>
    %6 = vector.broadcast %5 : vector<1x32xf32> to vector<8x32xf32>
    %c9 = arith.constant 9 : index
    %c0_5 = arith.constant 0 : index
    %7 = vector.load %arg2[%c9, %c0_5] : memref<16x96xf32, #tpu.memory_space<vmem>>, vector<1x32xf32>
    %c10 = arith.constant 10 : index
    %c0_6 = arith.constant 0 : index
    %8 = vector.load %arg2[%c10, %c0_6] : memref<16x96xf32, #tpu.memory_space<vmem>>, vector<1x32xf32>
    %c11 = arith.constant 11 : index
    %c0_7 = arith.constant 0 : index
    %9 = vector.load %arg2[%c11, %c0_7] : memref<16x96xf32, #tpu.memory_space<vmem>>, vector<1x3xf32>
    %c0_8 = arith.constant 0 : index
    %c0_9 = arith.constant 0 : index
    %10 = vector.load %arg0[%c0_8, %c0_9] : memref<64x4xf32, #tpu.memory_space<vmem>>, vector<8x4xf32>
    %11 = arith.truncf %10 : vector<8x4xf32> to vector<8x4xbf16>
    %c0_10 = arith.constant 0 : index
    %c0_11 = arith.constant 0 : index
    %12 = vector.load %arg1[%c0_10, %c0_11] : memref<224x96xbf16, #tpu.memory_space<vmem>>, vector<4x32xbf16>
    %cst = arith.constant dense<0.000000e+00> : vector<8x32xf32>
    %13 = tpu.matmul %11, %12, %cst {dimension_numbers = #tpu.dot_dimension_numbers<[1], [0], [0], [1], [0, 0, 1, 1], [], []>} : vector<8x4xbf16>, vector<4x32xbf16>, vector<8x32xf32> -> vector<8x32xf32>
    %c8_12 = arith.constant 8 : index
    %c0_13 = arith.constant 0 : index
    %14 = vector.load %arg0[%c8_12, %c0_13] : memref<64x4xf32, #tpu.memory_space<vmem>>, vector<8x4xf32>
    %15 = arith.truncf %14 : vector<8x4xf32> to vector<8x4xbf16>
    %c4 = arith.constant 4 : index
    %c0_14 = arith.constant 0 : index
    %16 = vector.load %arg1[%c4, %c0_14] : memref<224x96xbf16, #tpu.memory_space<vmem>>, vector<4x32xbf16>
    %cst_15 = arith.constant dense<0.000000e+00> : vector<8x32xf32>
    %17 = tpu.matmul %15, %16, %cst_15 {dimension_numbers = #tpu.dot_dimension_numbers<[1], [0], [0], [1], [0, 0, 1, 1], [], []>} : vector<8x4xbf16>, vector<4x32xbf16>, vector<8x32xf32> -> vector<8x32xf32>
    %c16 = arith.constant 16 : index
    %c0_16 = arith.constant 0 : index
    %18 = vector.load %arg0[%c16, %c0_16] : memref<64x4xf32, #tpu.memory_space<vmem>>, vector<8x4xf32>
    %19 = arith.truncf %18 : vector<8x4xf32> to vector<8x4xbf16>
    %c8_17 = arith.constant 8 : index
    %c0_18 = arith.constant 0 : index
    %20 = vector.load %arg1[%c8_17, %c0_18] : memref<224x96xbf16, #tpu.memory_space<vmem>>, vector<4x32xbf16>
    %cst_19 = arith.constant dense<0.000000e+00> : vector<8x32xf32>
    %21 = tpu.matmul %19, %20, %cst_19 {dimension_numbers = #tpu.dot_dimension_numbers<[1], [0], [0], [1], [0, 0, 1, 1], [], []>} : vector<8x4xbf16>, vector<4x32xbf16>, vector<8x32xf32> -> vector<8x32xf32>
    %c24 = arith.constant 24 : index
    %c0_20 = arith.constant 0 : index
    %22 = vector.load %arg0[%c24, %c0_20] : memref<64x4xf32, #tpu.memory_space<vmem>>, vector<8x4xf32>
    %23 = arith.truncf %22 : vector<8x4xf32> to vector<8x4xbf16>
    %c12 = arith.constant 12 : index
    %c0_21 = arith.constant 0 : index
    %24 = vector.load %arg1[%c12, %c0_21] : memref<224x96xbf16, #tpu.memory_space<vmem>>, vector<4x32xbf16>
    %cst_22 = arith.constant dense<0.000000e+00> : vector<8x32xf32>
    %25 = tpu.matmul %23, %24, %cst_22 {dimension_numbers = #tpu.dot_dimension_numbers<[1], [0], [0], [1], [0, 0, 1, 1], [], []>} : vector<8x4xbf16>, vector<4x32xbf16>, vector<8x32xf32> -> vector<8x32xf32>
    %c32_23 = arith.constant 32 : index
    %c0_24 = arith.constant 0 : index
    %26 = vector.load %arg0[%c32_23, %c0_24] : memref<64x4xf32, #tpu.memory_space<vmem>>, vector<8x4xf32>
    %27 = arith.truncf %26 : vector<8x4xf32> to vector<8x4xbf16>
    %c16_25 = arith.constant 16 : index
    %c0_26 = arith.constant 0 : index
    %28 = vector.load %arg1[%c16_25, %c0_26] : memref<224x96xbf16, #tpu.memory_space<vmem>>, vector<4x32xbf16>
    %cst_27 = arith.constant dense<0.000000e+00> : vector<8x32xf32>
    %29 = tpu.matmul %27, %28, %cst_27 {dimension_numbers = #tpu.dot_dimension_numbers<[1], [0], [0], [1], [0, 0, 1, 1], [], []>} : vector<8x4xbf16>, vector<4x32xbf16>, vector<8x32xf32> -> vector<8x32xf32>
    %c40 = arith.constant 40 : index
    %c0_28 = arith.constant 0 : index
    %30 = vector.load %arg0[%c40, %c0_28] : memref<64x4xf32, #tpu.memory_space<vmem>>, vector<8x4xf32>
    %31 = arith.truncf %30 : vector<8x4xf32> to vector<8x4xbf16>
    %c20 = arith.constant 20 : index
    %c0_29 = arith.constant 0 : index
    %32 = vector.load %arg1[%c20, %c0_29] : memref<224x96xbf16, #tpu.memory_space<vmem>>, vector<4x32xbf16>
    %cst_30 = arith.constant dense<0.000000e+00> : vector<8x32xf32>
    %33 = tpu.matmul %31, %32, %cst_30 {dimension_numbers = #tpu.dot_dimension_numbers<[1], [0], [0], [1], [0, 0, 1, 1], [], []>} : vector<8x4xbf16>, vector<4x32xbf16>, vector<8x32xf32> -> vector<8x32xf32>
    %c48 = arith.constant 48 : index
    %c0_31 = arith.constant 0 : index
    %34 = vector.load %arg0[%c48, %c0_31] : memref<64x4xf32, #tpu.memory_space<vmem>>, vector<8x4xf32>
    %35 = arith.truncf %34 : vector<8x4xf32> to vector<8x4xbf16>
    %c24_32 = arith.constant 24 : index
    %c0_33 = arith.constant 0 : index
    %36 = vector.load %arg1[%c24_32, %c0_33] : memref<224x96xbf16, #tpu.memory_space<vmem>>, vector<4x32xbf16>
    %cst_34 = arith.constant dense<0.000000e+00> : vector<8x32xf32>
    %37 = tpu.matmul %35, %36, %cst_34 {dimension_numbers = #tpu.dot_dimension_numbers<[1], [0], [0], [1], [0, 0, 1, 1], [], []>} : vector<8x4xbf16>, vector<4x32xbf16>, vector<8x32xf32> -> vector<8x32xf32>
    %c56 = arith.constant 56 : index
    %c0_35 = arith.constant 0 : index
    %38 = vector.load %arg0[%c56, %c0_35] : memref<64x4xf32, #tpu.memory_space<vmem>>, vector<8x4xf32>
    %39 = arith.truncf %38 : vector<8x4xf32> to vector<8x4xbf16>
    %c28 = arith.constant 28 : index
    %c0_36 = arith.constant 0 : index
    %40 = vector.load %arg1[%c28, %c0_36] : memref<224x96xbf16, #tpu.memory_space<vmem>>, vector<4x32xbf16>
    %cst_37 = arith.constant dense<0.000000e+00> : vector<8x32xf32>
    %41 = tpu.matmul %39, %40, %cst_37 {dimension_numbers = #tpu.dot_dimension_numbers<[1], [0], [0], [1], [0, 0, 1, 1], [], []>} : vector<8x4xbf16>, vector<4x32xbf16>, vector<8x32xf32> -> vector<8x32xf32>
    %42 = tpu.concatenate %13, %17, %21, %25, %29, %33, %37, %41 in 0 : vector<8x32xf32>, vector<8x32xf32>, vector<8x32xf32>, vector<8x32xf32>, vector<8x32xf32>, vector<8x32xf32>, vector<8x32xf32>, vector<8x32xf32> -> vector<64x32xf32>
    %43 = tpu.concatenate %3, %3, %3, %3, %3, %3, %3, %3 in 0 : vector<8x96xf32>, vector<8x96xf32>, vector<8x96xf32>, vector<8x96xf32>, vector<8x96xf32>, vector<8x96xf32>, vector<8x96xf32>, vector<8x96xf32> -> vector<64x96xf32>
    %cst_38 = arith.constant 0.000000e+00 : f32
    %44 = vector.broadcast %cst_38 : f32 to vector<64x32xf32>
    %45 = arith.maximumf %42, %44 : vector<64x32xf32>
    %46 = arith.truncf %45 : vector<64x32xf32> to vector<64x32xbf16>
    %cst_39 = arith.constant dense<0.000000e+00> : vector<64x96xf32>
    %47 = tpu.matmul %46, %0, %cst_39 {dimension_numbers = #tpu.dot_dimension_numbers<[1], [0], [0], [1], [0, 0, 1, 1], [], []>} : vector<64x32xbf16>, vector<32x96xbf16>, vector<64x96xf32> -> vector<64x96xf32>
    %48 = arith.addf %47, %43 : vector<64x96xf32>
    %49 = vector.extract_strided_slice %48 {offsets = [0, 0], sizes = [8, 96], strides = [1, 1]} : vector<64x96xf32> to vector<8x96xf32>
    %50 = vector.extract_strided_slice %49 {offsets = [0, 0], sizes = [8, 64], strides = [1, 1]} : vector<8x96xf32> to vector<8x64xf32>
    %cst_40 = arith.constant 0.000000e+00 : f32
    %51 = vector.broadcast %cst_40 : f32 to vector<8x64xf32>
    %52 = arith.subf %51, %50 : vector<8x64xf32>
    %53 = math.exp %52 : vector<8x64xf32>
    %cst_41 = arith.constant 1.000000e+00 : f32
    %54 = vector.broadcast %cst_41 : f32 to vector<8x64xf32>
    %55 = arith.addf %54, %53 : vector<8x64xf32>
    %56 = tpu.reciprocal %55 {approx = true} : vector<8x64xf32> -> vector<8x64xf32>
    %57 = vector.extract_strided_slice %56 {offsets = [0, 0], sizes = [8, 32], strides = [1, 1]} : vector<8x64xf32> to vector<8x32xf32>
    %58 = vector.extract_strided_slice %56 {offsets = [0, 32], sizes = [8, 32], strides = [1, 1]} : vector<8x64xf32> to vector<8x32xf32>
    %59 = vector.extract_strided_slice %49 {offsets = [0, 64], sizes = [8, 32], strides = [1, 1]} : vector<8x96xf32> to vector<8x32xf32>
    %60 = arith.mulf %57, %6 : vector<8x32xf32>
    %61 = arith.addf %59, %60 : vector<8x32xf32>
    %62 = math.tanh %61 : vector<8x32xf32>
    %cst_42 = arith.constant 1.000000e+00 : f32
    %63 = vector.broadcast %cst_42 : f32 to vector<8x32xf32>
    %64 = arith.subf %63, %58 : vector<8x32xf32>
    %65 = arith.mulf %64, %62 : vector<8x32xf32>
    %66 = vector.extract_strided_slice %48 {offsets = [8, 0], sizes = [8, 96], strides = [1, 1]} : vector<64x96xf32> to vector<8x96xf32>
    %67 = arith.truncf %65 : vector<8x32xf32> to vector<8x32xbf16>
    %cst_43 = arith.constant dense<0.000000e+00> : vector<8x96xf32>
    %68 = tpu.matmul %67, %1, %cst_43 {dimension_numbers = #tpu.dot_dimension_numbers<[1], [0], [0], [1], [0, 0, 1, 1], [], []>} : vector<8x32xbf16>, vector<32x96xbf16>, vector<8x96xf32> -> vector<8x96xf32>
    %69 = vector.extract_strided_slice %66 {offsets = [0, 0], sizes = [8, 64], strides = [1, 1]} : vector<8x96xf32> to vector<8x64xf32>
    %70 = vector.extract_strided_slice %68 {offsets = [0, 0], sizes = [8, 64], strides = [1, 1]} : vector<8x96xf32> to vector<8x64xf32>
    %71 = arith.addf %69, %70 : vector<8x64xf32>
    %cst_44 = arith.constant 0.000000e+00 : f32
    %72 = vector.broadcast %cst_44 : f32 to vector<8x64xf32>
    %73 = arith.subf %72, %71 : vector<8x64xf32>
    %74 = math.exp %73 : vector<8x64xf32>
    %cst_45 = arith.constant 1.000000e+00 : f32
    %75 = vector.broadcast %cst_45 : f32 to vector<8x64xf32>
    %76 = arith.addf %75, %74 : vector<8x64xf32>
    %77 = tpu.reciprocal %76 {approx = true} : vector<8x64xf32> -> vector<8x64xf32>
    %78 = vector.extract_strided_slice %77 {offsets = [0, 0], sizes = [8, 32], strides = [1, 1]} : vector<8x64xf32> to vector<8x32xf32>
    %79 = vector.extract_strided_slice %77 {offsets = [0, 32], sizes = [8, 32], strides = [1, 1]} : vector<8x64xf32> to vector<8x32xf32>
    %80 = vector.extract_strided_slice %66 {offsets = [0, 64], sizes = [8, 32], strides = [1, 1]} : vector<8x96xf32> to vector<8x32xf32>
    %81 = vector.extract_strided_slice %68 {offsets = [0, 64], sizes = [8, 32], strides = [1, 1]} : vector<8x96xf32> to vector<8x32xf32>
    %82 = arith.addf %81, %6 : vector<8x32xf32>
    %83 = arith.mulf %78, %82 : vector<8x32xf32>
    %84 = arith.addf %80, %83 : vector<8x32xf32>
    %85 = math.tanh %84 : vector<8x32xf32>
    %86 = arith.subf %65, %85 : vector<8x32xf32>
    %87 = arith.mulf %79, %86 : vector<8x32xf32>
    %88 = arith.addf %85, %87 : vector<8x32xf32>
    %89 = vector.extract_strided_slice %48 {offsets = [16, 0], sizes = [8, 96], strides = [1, 1]} : vector<64x96xf32> to vector<8x96xf32>
    %90 = arith.truncf %88 : vector<8x32xf32> to vector<8x32xbf16>
    %cst_46 = arith.constant dense<0.000000e+00> : vector<8x96xf32>
    %91 = tpu.matmul %90, %1, %cst_46 {dimension_numbers = #tpu.dot_dimension_numbers<[1], [0], [0], [1], [0, 0, 1, 1], [], []>} : vector<8x32xbf16>, vector<32x96xbf16>, vector<8x96xf32> -> vector<8x96xf32>
    %92 = vector.extract_strided_slice %89 {offsets = [0, 0], sizes = [8, 64], strides = [1, 1]} : vector<8x96xf32> to vector<8x64xf32>
    %93 = vector.extract_strided_slice %91 {offsets = [0, 0], sizes = [8, 64], strides = [1, 1]} : vector<8x96xf32> to vector<8x64xf32>
    %94 = arith.addf %92, %93 : vector<8x64xf32>
    %cst_47 = arith.constant 0.000000e+00 : f32
    %95 = vector.broadcast %cst_47 : f32 to vector<8x64xf32>
    %96 = arith.subf %95, %94 : vector<8x64xf32>
    %97 = math.exp %96 : vector<8x64xf32>
    %cst_48 = arith.constant 1.000000e+00 : f32
    %98 = vector.broadcast %cst_48 : f32 to vector<8x64xf32>
    %99 = arith.addf %98, %97 : vector<8x64xf32>
    %100 = tpu.reciprocal %99 {approx = true} : vector<8x64xf32> -> vector<8x64xf32>
    %101 = vector.extract_strided_slice %100 {offsets = [0, 0], sizes = [8, 32], strides = [1, 1]} : vector<8x64xf32> to vector<8x32xf32>
    %102 = vector.extract_strided_slice %100 {offsets = [0, 32], sizes = [8, 32], strides = [1, 1]} : vector<8x64xf32> to vector<8x32xf32>
    %103 = vector.extract_strided_slice %89 {offsets = [0, 64], sizes = [8, 32], strides = [1, 1]} : vector<8x96xf32> to vector<8x32xf32>
    %104 = vector.extract_strided_slice %91 {offsets = [0, 64], sizes = [8, 32], strides = [1, 1]} : vector<8x96xf32> to vector<8x32xf32>
    %105 = arith.addf %104, %6 : vector<8x32xf32>
    %106 = arith.mulf %101, %105 : vector<8x32xf32>
    %107 = arith.addf %103, %106 : vector<8x32xf32>
    %108 = math.tanh %107 : vector<8x32xf32>
    %109 = arith.subf %88, %108 : vector<8x32xf32>
    %110 = arith.mulf %102, %109 : vector<8x32xf32>
    %111 = arith.addf %108, %110 : vector<8x32xf32>
    %112 = vector.extract_strided_slice %48 {offsets = [24, 0], sizes = [8, 96], strides = [1, 1]} : vector<64x96xf32> to vector<8x96xf32>
    %113 = arith.truncf %111 : vector<8x32xf32> to vector<8x32xbf16>
    %cst_49 = arith.constant dense<0.000000e+00> : vector<8x96xf32>
    %114 = tpu.matmul %113, %1, %cst_49 {dimension_numbers = #tpu.dot_dimension_numbers<[1], [0], [0], [1], [0, 0, 1, 1], [], []>} : vector<8x32xbf16>, vector<32x96xbf16>, vector<8x96xf32> -> vector<8x96xf32>
    %115 = vector.extract_strided_slice %112 {offsets = [0, 0], sizes = [8, 64], strides = [1, 1]} : vector<8x96xf32> to vector<8x64xf32>
    %116 = vector.extract_strided_slice %114 {offsets = [0, 0], sizes = [8, 64], strides = [1, 1]} : vector<8x96xf32> to vector<8x64xf32>
    %117 = arith.addf %115, %116 : vector<8x64xf32>
    %cst_50 = arith.constant 0.000000e+00 : f32
    %118 = vector.broadcast %cst_50 : f32 to vector<8x64xf32>
    %119 = arith.subf %118, %117 : vector<8x64xf32>
    %120 = math.exp %119 : vector<8x64xf32>
    %cst_51 = arith.constant 1.000000e+00 : f32
    %121 = vector.broadcast %cst_51 : f32 to vector<8x64xf32>
    %122 = arith.addf %121, %120 : vector<8x64xf32>
    %123 = tpu.reciprocal %122 {approx = true} : vector<8x64xf32> -> vector<8x64xf32>
    %124 = vector.extract_strided_slice %123 {offsets = [0, 0], sizes = [8, 32], strides = [1, 1]} : vector<8x64xf32> to vector<8x32xf32>
    %125 = vector.extract_strided_slice %123 {offsets = [0, 32], sizes = [8, 32], strides = [1, 1]} : vector<8x64xf32> to vector<8x32xf32>
    %126 = vector.extract_strided_slice %112 {offsets = [0, 64], sizes = [8, 32], strides = [1, 1]} : vector<8x96xf32> to vector<8x32xf32>
    %127 = vector.extract_strided_slice %114 {offsets = [0, 64], sizes = [8, 32], strides = [1, 1]} : vector<8x96xf32> to vector<8x32xf32>
    %128 = arith.addf %127, %6 : vector<8x32xf32>
    %129 = arith.mulf %124, %128 : vector<8x32xf32>
    %130 = arith.addf %126, %129 : vector<8x32xf32>
    %131 = math.tanh %130 : vector<8x32xf32>
    %132 = arith.subf %111, %131 : vector<8x32xf32>
    %133 = arith.mulf %125, %132 : vector<8x32xf32>
    %134 = arith.addf %131, %133 : vector<8x32xf32>
    %135 = vector.extract_strided_slice %48 {offsets = [32, 0], sizes = [8, 96], strides = [1, 1]} : vector<64x96xf32> to vector<8x96xf32>
    %136 = arith.truncf %134 : vector<8x32xf32> to vector<8x32xbf16>
    %cst_52 = arith.constant dense<0.000000e+00> : vector<8x96xf32>
    %137 = tpu.matmul %136, %1, %cst_52 {dimension_numbers = #tpu.dot_dimension_numbers<[1], [0], [0], [1], [0, 0, 1, 1], [], []>} : vector<8x32xbf16>, vector<32x96xbf16>, vector<8x96xf32> -> vector<8x96xf32>
    %138 = vector.extract_strided_slice %135 {offsets = [0, 0], sizes = [8, 64], strides = [1, 1]} : vector<8x96xf32> to vector<8x64xf32>
    %139 = vector.extract_strided_slice %137 {offsets = [0, 0], sizes = [8, 64], strides = [1, 1]} : vector<8x96xf32> to vector<8x64xf32>
    %140 = arith.addf %138, %139 : vector<8x64xf32>
    %cst_53 = arith.constant 0.000000e+00 : f32
    %141 = vector.broadcast %cst_53 : f32 to vector<8x64xf32>
    %142 = arith.subf %141, %140 : vector<8x64xf32>
    %143 = math.exp %142 : vector<8x64xf32>
    %cst_54 = arith.constant 1.000000e+00 : f32
    %144 = vector.broadcast %cst_54 : f32 to vector<8x64xf32>
    %145 = arith.addf %144, %143 : vector<8x64xf32>
    %146 = tpu.reciprocal %145 {approx = true} : vector<8x64xf32> -> vector<8x64xf32>
    %147 = vector.extract_strided_slice %146 {offsets = [0, 0], sizes = [8, 32], strides = [1, 1]} : vector<8x64xf32> to vector<8x32xf32>
    %148 = vector.extract_strided_slice %146 {offsets = [0, 32], sizes = [8, 32], strides = [1, 1]} : vector<8x64xf32> to vector<8x32xf32>
    %149 = vector.extract_strided_slice %135 {offsets = [0, 64], sizes = [8, 32], strides = [1, 1]} : vector<8x96xf32> to vector<8x32xf32>
    %150 = vector.extract_strided_slice %137 {offsets = [0, 64], sizes = [8, 32], strides = [1, 1]} : vector<8x96xf32> to vector<8x32xf32>
    %151 = arith.addf %150, %6 : vector<8x32xf32>
    %152 = arith.mulf %147, %151 : vector<8x32xf32>
    %153 = arith.addf %149, %152 : vector<8x32xf32>
    %154 = math.tanh %153 : vector<8x32xf32>
    %155 = arith.subf %134, %154 : vector<8x32xf32>
    %156 = arith.mulf %148, %155 : vector<8x32xf32>
    %157 = arith.addf %154, %156 : vector<8x32xf32>
    %158 = vector.extract_strided_slice %48 {offsets = [40, 0], sizes = [8, 96], strides = [1, 1]} : vector<64x96xf32> to vector<8x96xf32>
    %159 = arith.truncf %157 : vector<8x32xf32> to vector<8x32xbf16>
    %cst_55 = arith.constant dense<0.000000e+00> : vector<8x96xf32>
    %160 = tpu.matmul %159, %1, %cst_55 {dimension_numbers = #tpu.dot_dimension_numbers<[1], [0], [0], [1], [0, 0, 1, 1], [], []>} : vector<8x32xbf16>, vector<32x96xbf16>, vector<8x96xf32> -> vector<8x96xf32>
    %161 = vector.extract_strided_slice %158 {offsets = [0, 0], sizes = [8, 64], strides = [1, 1]} : vector<8x96xf32> to vector<8x64xf32>
    %162 = vector.extract_strided_slice %160 {offsets = [0, 0], sizes = [8, 64], strides = [1, 1]} : vector<8x96xf32> to vector<8x64xf32>
    %163 = arith.addf %161, %162 : vector<8x64xf32>
    %cst_56 = arith.constant 0.000000e+00 : f32
    %164 = vector.broadcast %cst_56 : f32 to vector<8x64xf32>
    %165 = arith.subf %164, %163 : vector<8x64xf32>
    %166 = math.exp %165 : vector<8x64xf32>
    %cst_57 = arith.constant 1.000000e+00 : f32
    %167 = vector.broadcast %cst_57 : f32 to vector<8x64xf32>
    %168 = arith.addf %167, %166 : vector<8x64xf32>
    %169 = tpu.reciprocal %168 {approx = true} : vector<8x64xf32> -> vector<8x64xf32>
    %170 = vector.extract_strided_slice %169 {offsets = [0, 0], sizes = [8, 32], strides = [1, 1]} : vector<8x64xf32> to vector<8x32xf32>
    %171 = vector.extract_strided_slice %169 {offsets = [0, 32], sizes = [8, 32], strides = [1, 1]} : vector<8x64xf32> to vector<8x32xf32>
    %172 = vector.extract_strided_slice %158 {offsets = [0, 64], sizes = [8, 32], strides = [1, 1]} : vector<8x96xf32> to vector<8x32xf32>
    %173 = vector.extract_strided_slice %160 {offsets = [0, 64], sizes = [8, 32], strides = [1, 1]} : vector<8x96xf32> to vector<8x32xf32>
    %174 = arith.addf %173, %6 : vector<8x32xf32>
    %175 = arith.mulf %170, %174 : vector<8x32xf32>
    %176 = arith.addf %172, %175 : vector<8x32xf32>
    %177 = math.tanh %176 : vector<8x32xf32>
    %178 = arith.subf %157, %177 : vector<8x32xf32>
    %179 = arith.mulf %171, %178 : vector<8x32xf32>
    %180 = arith.addf %177, %179 : vector<8x32xf32>
    %181 = vector.extract_strided_slice %48 {offsets = [48, 0], sizes = [8, 96], strides = [1, 1]} : vector<64x96xf32> to vector<8x96xf32>
    %182 = arith.truncf %180 : vector<8x32xf32> to vector<8x32xbf16>
    %cst_58 = arith.constant dense<0.000000e+00> : vector<8x96xf32>
    %183 = tpu.matmul %182, %1, %cst_58 {dimension_numbers = #tpu.dot_dimension_numbers<[1], [0], [0], [1], [0, 0, 1, 1], [], []>} : vector<8x32xbf16>, vector<32x96xbf16>, vector<8x96xf32> -> vector<8x96xf32>
    %184 = vector.extract_strided_slice %181 {offsets = [0, 0], sizes = [8, 64], strides = [1, 1]} : vector<8x96xf32> to vector<8x64xf32>
    %185 = vector.extract_strided_slice %183 {offsets = [0, 0], sizes = [8, 64], strides = [1, 1]} : vector<8x96xf32> to vector<8x64xf32>
    %186 = arith.addf %184, %185 : vector<8x64xf32>
    %cst_59 = arith.constant 0.000000e+00 : f32
    %187 = vector.broadcast %cst_59 : f32 to vector<8x64xf32>
    %188 = arith.subf %187, %186 : vector<8x64xf32>
    %189 = math.exp %188 : vector<8x64xf32>
    %cst_60 = arith.constant 1.000000e+00 : f32
    %190 = vector.broadcast %cst_60 : f32 to vector<8x64xf32>
    %191 = arith.addf %190, %189 : vector<8x64xf32>
    %192 = tpu.reciprocal %191 {approx = true} : vector<8x64xf32> -> vector<8x64xf32>
    %193 = vector.extract_strided_slice %192 {offsets = [0, 0], sizes = [8, 32], strides = [1, 1]} : vector<8x64xf32> to vector<8x32xf32>
    %194 = vector.extract_strided_slice %192 {offsets = [0, 32], sizes = [8, 32], strides = [1, 1]} : vector<8x64xf32> to vector<8x32xf32>
    %195 = vector.extract_strided_slice %181 {offsets = [0, 64], sizes = [8, 32], strides = [1, 1]} : vector<8x96xf32> to vector<8x32xf32>
    %196 = vector.extract_strided_slice %183 {offsets = [0, 64], sizes = [8, 32], strides = [1, 1]} : vector<8x96xf32> to vector<8x32xf32>
    %197 = arith.addf %196, %6 : vector<8x32xf32>
    %198 = arith.mulf %193, %197 : vector<8x32xf32>
    %199 = arith.addf %195, %198 : vector<8x32xf32>
    %200 = math.tanh %199 : vector<8x32xf32>
    %201 = arith.subf %180, %200 : vector<8x32xf32>
    %202 = arith.mulf %194, %201 : vector<8x32xf32>
    %203 = arith.addf %200, %202 : vector<8x32xf32>
    %204 = vector.extract_strided_slice %48 {offsets = [56, 0], sizes = [8, 96], strides = [1, 1]} : vector<64x96xf32> to vector<8x96xf32>
    %205 = arith.truncf %203 : vector<8x32xf32> to vector<8x32xbf16>
    %cst_61 = arith.constant dense<0.000000e+00> : vector<8x96xf32>
    %206 = tpu.matmul %205, %1, %cst_61 {dimension_numbers = #tpu.dot_dimension_numbers<[1], [0], [0], [1], [0, 0, 1, 1], [], []>} : vector<8x32xbf16>, vector<32x96xbf16>, vector<8x96xf32> -> vector<8x96xf32>
    %207 = vector.extract_strided_slice %204 {offsets = [0, 0], sizes = [8, 64], strides = [1, 1]} : vector<8x96xf32> to vector<8x64xf32>
    %208 = vector.extract_strided_slice %206 {offsets = [0, 0], sizes = [8, 64], strides = [1, 1]} : vector<8x96xf32> to vector<8x64xf32>
    %209 = arith.addf %207, %208 : vector<8x64xf32>
    %cst_62 = arith.constant 0.000000e+00 : f32
    %210 = vector.broadcast %cst_62 : f32 to vector<8x64xf32>
    %211 = arith.subf %210, %209 : vector<8x64xf32>
    %212 = math.exp %211 : vector<8x64xf32>
    %cst_63 = arith.constant 1.000000e+00 : f32
    %213 = vector.broadcast %cst_63 : f32 to vector<8x64xf32>
    %214 = arith.addf %213, %212 : vector<8x64xf32>
    %215 = tpu.reciprocal %214 {approx = true} : vector<8x64xf32> -> vector<8x64xf32>
    %216 = vector.extract_strided_slice %215 {offsets = [0, 0], sizes = [8, 32], strides = [1, 1]} : vector<8x64xf32> to vector<8x32xf32>
    %217 = vector.extract_strided_slice %215 {offsets = [0, 32], sizes = [8, 32], strides = [1, 1]} : vector<8x64xf32> to vector<8x32xf32>
    %218 = vector.extract_strided_slice %204 {offsets = [0, 64], sizes = [8, 32], strides = [1, 1]} : vector<8x96xf32> to vector<8x32xf32>
    %219 = vector.extract_strided_slice %206 {offsets = [0, 64], sizes = [8, 32], strides = [1, 1]} : vector<8x96xf32> to vector<8x32xf32>
    %220 = arith.addf %219, %6 : vector<8x32xf32>
    %221 = arith.mulf %216, %220 : vector<8x32xf32>
    %222 = arith.addf %218, %221 : vector<8x32xf32>
    %223 = math.tanh %222 : vector<8x32xf32>
    %224 = arith.subf %203, %223 : vector<8x32xf32>
    %225 = arith.mulf %217, %224 : vector<8x32xf32>
    %226 = arith.addf %223, %225 : vector<8x32xf32>
    %cst_64 = arith.constant dense<0.000000e+00> : vector<8xf32>
    %227 = vector.multi_reduction <add>, %226, %cst_64 [1] : vector<8x32xf32> to vector<8xf32>
    %228 = vector.shape_cast %227 : vector<8xf32> to vector<8x1xf32>
    %cst_65 = arith.constant 3.200000e+01 : f32
    %229 = vector.broadcast %cst_65 : f32 to vector<8x1xf32>
    %230 = arith.divf %228, %229 : vector<8x1xf32>
    %231 = vector.broadcast %230 : vector<8x1xf32> to vector<8x32xf32>
    %232 = arith.subf %226, %231 : vector<8x32xf32>
    %233 = arith.mulf %232, %232 : vector<8x32xf32>
    %cst_66 = arith.constant dense<0.000000e+00> : vector<8xf32>
    %234 = vector.multi_reduction <add>, %233, %cst_66 [1] : vector<8x32xf32> to vector<8xf32>
    %235 = vector.shape_cast %234 : vector<8xf32> to vector<8x1xf32>
    %cst_67 = arith.constant 3.200000e+01 : f32
    %236 = vector.broadcast %cst_67 : f32 to vector<8x1xf32>
    %237 = arith.divf %235, %236 : vector<8x1xf32>
    %238 = vector.broadcast %230 : vector<8x1xf32> to vector<8x32xf32>
    %239 = arith.subf %226, %238 : vector<8x32xf32>
    %cst_68 = arith.constant 9.99999997E-7 : f32
    %240 = vector.broadcast %cst_68 : f32 to vector<8x1xf32>
    %241 = arith.addf %237, %240 : vector<8x1xf32>
    %242 = math.rsqrt %241 : vector<8x1xf32>
    %243 = vector.broadcast %242 : vector<8x1xf32> to vector<8x32xf32>
    %244 = arith.mulf %239, %243 : vector<8x32xf32>
    %245 = vector.broadcast %7 : vector<1x32xf32> to vector<8x32xf32>
    %246 = arith.mulf %244, %245 : vector<8x32xf32>
    %247 = vector.broadcast %8 : vector<1x32xf32> to vector<8x32xf32>
    %248 = arith.addf %246, %247 : vector<8x32xf32>
    %249 = vector.extract_strided_slice %248 {offsets = [0, 0], sizes = [1, 32], strides = [1, 1]} : vector<8x32xf32> to vector<1x32xf32>
    %250 = vector.extract_strided_slice %248 {offsets = [1, 0], sizes = [1, 32], strides = [1, 1]} : vector<8x32xf32> to vector<1x32xf32>
    %251 = vector.extract_strided_slice %248 {offsets = [2, 0], sizes = [1, 32], strides = [1, 1]} : vector<8x32xf32> to vector<1x32xf32>
    %252 = vector.extract_strided_slice %248 {offsets = [3, 0], sizes = [1, 32], strides = [1, 1]} : vector<8x32xf32> to vector<1x32xf32>
    %253 = tpu.concatenate %249, %250, %251, %252 in 1 : vector<1x32xf32>, vector<1x32xf32>, vector<1x32xf32>, vector<1x32xf32> -> vector<1x128xf32>
    %254 = vector.extract_strided_slice %248 {offsets = [4, 0], sizes = [1, 32], strides = [1, 1]} : vector<8x32xf32> to vector<1x32xf32>
    %255 = vector.extract_strided_slice %248 {offsets = [5, 0], sizes = [1, 32], strides = [1, 1]} : vector<8x32xf32> to vector<1x32xf32>
    %256 = vector.extract_strided_slice %248 {offsets = [6, 0], sizes = [1, 32], strides = [1, 1]} : vector<8x32xf32> to vector<1x32xf32>
    %257 = vector.extract_strided_slice %248 {offsets = [7, 0], sizes = [1, 32], strides = [1, 1]} : vector<8x32xf32> to vector<1x32xf32>
    %258 = tpu.concatenate %254, %255, %256, %257 in 1 : vector<1x32xf32>, vector<1x32xf32>, vector<1x32xf32>, vector<1x32xf32> -> vector<1x128xf32>
    %259 = tpu.concatenate %253, %258 in 0 : vector<1x128xf32>, vector<1x128xf32> -> vector<2x128xf32>
    %260 = arith.truncf %259 : vector<2x128xf32> to vector<2x128xbf16>
    %cst_69 = arith.constant dense<0.000000e+00> : vector<2x3xf32>
    %261 = tpu.matmul %260, %2, %cst_69 {dimension_numbers = #tpu.dot_dimension_numbers<[1], [0], [0], [1], [0, 0, 1, 1], [], []>} : vector<2x128xbf16>, vector<128x3xbf16>, vector<2x3xf32> -> vector<2x3xf32>
    %262 = vector.broadcast %9 : vector<1x3xf32> to vector<2x3xf32>
    %263 = arith.addf %261, %262 : vector<2x3xf32>
    %c0_70 = arith.constant 0 : index
    %c0_71 = arith.constant 0 : index
    %264 = vector.load %arg3[%c0_70, %c0_71] : memref<2x3xf32, #tpu.memory_space<vmem>>, vector<2x3xf32>
    tpu.vector_store %arg3[%c0_70, %c0_71], %263 {strides = array<i32>} : memref<2x3xf32, #tpu.memory_space<vmem>>, vector<2x3xf32>,
    return
  }
}

</mosaic_0001>

<bundles_post_ra>
// kernel: state_graph_forward.1
= control target key start
LH: loop header
LB: loop body
LE: loop exit
PB: predicated region body
PF: predicated region fallthrough
CT: control target
= control target key end

     0   :  { %vm53_vm0 = vcmask 1041408   ;;  %vm49_vm1 = vcmask 31744   ;;  %s1242_s0 = inlined_call_operand.vmem [shape: f32[64,4], index: 0, kind: input, shape index: {}]   ;;  %s1243_s1 = inlined_call_operand.vmem [shape: bf16[224,96], index: 1, kind: input, shape index: {}]   ;;  %s1244_s2 = inlined_call_operand.vmem [shape: f32[16,96], index: 2, kind: input, shape index: {}]   ;;  %s1245_s3 = inlined_call_operand.hbm [shape: f32[2,3], index: 3, kind: output, shape index: {}]  }
   0x1   :  { %v48_v0 = vld [vmem:[%s1243_s1] sm:$0x3]  ;;  %v72_v4 = vld [vmem:[%s1243_s1] sm:$0xc]  ;;  %v98_v5 = vld [vmem:[%s1243_s1 + $0x4] sm:$0x3] }
   0x2   :  { %v46_v1 = vld [vmem:[%s1242_s0] sm:$0xff]  ;;  %v55_v2 = vsel %vm53_vm0, %v48_v0, 0  ;;  %v96_v6 = vld [vmem:[%s1242_s0 + $0x10] sm:$0xff]  ;;  %v74_v7 = vunpack.c.l.b16 %v72_v4  ;;  %v103_v8 = vsel %vm53_vm0, %v98_v5, 0  ;;  %v146_v11 = vld [vmem:[%s1243_s1 + $0x8] sm:$0x3] }
   0x3   :  { %v47_v3 = vpack.c.bf16 %v46_v1, %v46_v1  ;;  %64 = vmatpush.bf16.msra.mxu3 %v55_v2  ;;  %v120_v9 = vld [vmem:[%s1243_s1 + $0x4] sm:$0xc]  ;;  %v97_v10 = vpack.c.bf16 %v96_v6, %v96_v6  ;;  %112 = vmatpush.bf16.msra.mxu2 %v103_v8  ;;  %v151_v13 = vsel %vm53_vm0, %v146_v11, 0  ;;  %v168_v14 = vld [vmem:[%s1243_s1 + $0x8] sm:$0xc]  ;;  %v905_v20 = vld [vmem:[%s1243_s1 + $0x18] sm:$0xff] }
   0x4   :  { %v122_v12 = vunpack.c.l.b16 %v120_v9  ;;  %v144_v15 = vld [vmem:[%s1242_s0 + $0x20] sm:$0xff]  ;;  %v75_v16 = vpack.c.b16 %v74_v7, %v74_v7  ;;  %v70_v17 = vld [vmem:[%s1242_s0 + $0x8] sm:$0xff]  ;;  %160 = vmatpush.bf16.msra.mxu0 %v151_v13  ;;  %v170_v18 = vunpack.c.l.b16 %v168_v14  ;;  %v904_v24 = vld [vmem:[%s1243_s1 + $0x10] sm:$0xff] }
   0x5   :  { %v145_v19 = vpack.c.bf16 %v144_v15, %v144_v15 }
   0x6   :  { %837 = vmatmul.msk.bf16.vlgmr.msra.gmra.mxu3 %vm49_vm1, %v47_v3  ;;  %v123_v21 = vpack.c.b16 %v122_v12, %v122_v12  ;;  %v76_v22 = vrot.slane %v75_v16, 2  ;;  %839 = vmatmul.msk.bf16.vlgmr.msra.gmra.mxu2 %vm49_vm1, %v97_v10  ;;  %v171_v23 = vpack.c.b16 %v170_v18, %v170_v18 }
   0x8   :  { %283 = vmatpush.bf16.msrb.mxu0 %v905_v20 }
   0x9   :  { %8 = vsyncpa [#allocation3], 0  ;;  %v124_v25 = vrot.slane %v123_v21, 2  ;;  %841 = vmatmul.msk.bf16.vlgmr.msra.gmra.mxu0 %vm49_vm1, %v145_v19  ;;  %v81_v26 = vsel %vm53_vm0, %v76_v22, 0  ;;  %v71_v27 = vpack.c.bf16 %v70_v17, %v70_v17  ;;  %v172_v28 = vrot.slane %v171_v23, 2  ;;  %v118_v31 = vld [vmem:[%s1242_s0 + $0x18] sm:$0xff] }
   0xa   :  { %90 = vmatpush.bf16.msra.mxu1 %v81_v26  ;;  %v119_v32 = vpack.c.bf16 %v118_v31, %v118_v31  ;;  %v166_v33 = vld [vmem:[%s1242_s0 + $0x28] sm:$0xff]  ;;  %vm264_vm2 = vcmask 261120   ;;  %v1088_v56 = vld [vmem:[%s1244_s2] sm:$0xff]  ;;  %s1003_s17 = smov 64   ;;  %s1004_s18 = smov 96   ;;  %vm747_vm7 = vcmask 523264  }
   0xb   :  { %v129_v29 = vsel %vm53_vm0, %v124_v25, 0  ;;  %v177_v30 = vsel %vm53_vm0, %v172_v28, 0  ;;  %v167_v34 = vpack.c.bf16 %v166_v33, %v166_v33  ;;  %v921_v63 = vld [vmem:[%s1244_s2 + $0x8] ss:$0 sm:$0xff]  ;;  %v1105_v6 = vld [vmem:[%s1243_s1 + $0x20] sm:$0xff]  ;;  %s1005_s23 = smov 32  }
   0xc   :  { %138 = vmatpush.bf16.msrb.mxu3 %v129_v29  ;;  %284 = vmatpush.bf16.msrb.mxu0 %v904_v24  ;;  %v1099_v5 = vld [vmem:[%s1243_s1 + $0x28] sm:$0xff]  ;;  %vm749_vm8 = vcmask 785408   ;;  %vm754_vm9 = vcmask 1040384   ;;  %s828_s29 = sshll.u32 %s1245_s3, 4  ;;  %vm819_vm10 = vcmask 17408   ;;  %s829_s29 = int_to_ptr.hbm [resolvable:$true] %s828_s29 }
   0xd   :  { %838 = vmatmul.msk.bf16.vlgmr.msra.gmra.mxu1 %vm49_vm1, %v71_v27  ;;  %v216_v33 = vld [vmem:[%s1243_s1 + $0xc] sm:$0xc] }
   0xe   :  { %186 = vmatpush.bf16.msrb.mxu1 %v177_v30 }
  0x12   :  { %349 = vmatpush.bf16.msra.mxu1 %v1099_v5 }
  0x16   :  { %840 = vmatmul.msk.bf16.vlgmr.msrb.gmra.mxu3 %vm49_vm1, %v119_v32  ;;  %350 = vmatpush.bf16.msra.mxu1 %v1105_v6  ;;  %v194_v32 = vld [vmem:[%s1243_s1 + $0xc] sm:$0x3] }
  0x1d   :  { %842 = vmatmul.msk.bf16.vlgmr.msrb.gmra.mxu1 %vm49_vm1, %v167_v34  ;;  %v192_v34 = vld [vmem:[%s1242_s0 + $0x30] sm:$0xff] }
  0x1e   :  { %500 = vmatpush.bf16.msrb.mxu1 %v1099_v5 }
  0x22   :  { %501 = vmatpush.bf16.msrb.mxu1 %v1105_v6 }
  0x86   :  { %v162_v35 = vpop.f32.mrf.mxu0 }
  0x87   :  { %v244_v53 = vmax.f32 %v162_v35, 0.0  ;;  %v199_v35 = vsel %vm53_vm0, %v194_v32, 0 }
  0x88   :  { %208 = vmatpush.bf16.msrb.mxu2 %v199_v35 }
  0x89   :  { %v66_v36 = vpop.f32.mrf.mxu3  ;;  %v114_v39 = vpop.f32.mrf.mxu2 }
  0x8a   :  { %v240_v37 = vmax.f32 %v66_v36, 0.0  ;;  %v92_v38 = vpop.f32.mrf.mxu1  ;;  %v242_v46 = vmax.f32 %v114_v39, 0.0  ;;  %v218_v36 = vunpack.c.l.b16 %v216_v33  ;;  %v214_v39 = vld [vmem:[%s1242_s0 + $0x38] sm:$0xff] }
  0x8b   :  { %v241_v40 = vmax.f32 %v92_v38, 0.0 }
  0x8c   :  { %v219_v38 = vpack.c.b16 %v218_v36, %v218_v36  ;;  %402 = vmatpush.bf16.msra.mxu2 %v1099_v5 }
  0x8d   :  { %v248_v41 = vpack.c.bf16 %v241_v40, %v240_v37  ;;  %v193_v37 = vpack.c.bf16 %v192_v34, %v192_v34 }
  0x8e   :  { %v164_v42 = vpop.f32.mrf.mxu0  ;;  %v220_v40 = vrot.slane %v219_v38, 2 }
  0x8f   :  { %853 = vmatmul.msk.bf16.vlgmr.msrb.gmra.mxu0 %vm264_vm2, %v248_v41  ;;  %843 = vmatmul.msk.bf16.vlgmr.msrb.gmra.mxu2 %vm49_vm1, %v193_v37  ;;  %v215_v42 = vpack.c.bf16 %v214_v39, %v214_v39 }
  0x90   :  { %v225_v41 = vsel %vm53_vm0, %v220_v40, 0  ;;  %403 = vmatpush.bf16.msra.mxu2 %v1105_v6 }
  0x91   :  { %v68_v43 = vpop.f32.mrf.mxu3  ;;  %v116_v45 = vpop.f32.mrf.mxu2  ;;  %234 = vmatpush.bf16.msra.mxu3 %v225_v41 }
  0x92   :  { %v94_v44 = vpop.f32.mrf.mxu1 }
  0x94   :  { %549 = vmatpush.bf16.msrb.mxu2 %v1099_v5  ;;  %844 = vmatmul.msk.bf16.vlgmr.msra.gmra.mxu3 %vm49_vm1, %v215_v42 }
  0x95   :  { %451 = vmatpush.bf16.msrb.mxu3 %v1099_v5 }
  0x98   :  { %550 = vmatpush.bf16.msrb.mxu2 %v1105_v6 }
  0x99   :  { %v140_v47 = vpop.f32.mrf.mxu3  ;;  %452 = vmatpush.bf16.msrb.mxu3 %v1105_v6 }
  0x9a   :  { %v243_v48 = vmax.f32 %v140_v47, 0.0  ;;  %v188_v49 = vpop.f32.mrf.mxu1 }
  0x9b   :  { %v245_v54 = vmax.f32 %v188_v49, 0.0 }
  0x9c   :  { %v249_v50 = vpack.c.bf16 %v243_v48, %v242_v46 }
  0x9d   :  { %v250_v55 = vpack.c.bf16 %v245_v54, %v244_v53  ;;  %598 = vmatpush.bf16.msra.mxu3 %v1099_v5 }
  0x9f   :  { %854 = vmatmul.msk.bf16.gmra.mxu0 %vm264_vm2, %v249_v50 }
  0xa1   :  { %v142_v51 = vpop.f32.mrf.mxu3  ;;  %599 = vmatpush.bf16.msra.mxu3 %v1105_v6 }
  0xa2   :  { %v190_v52 = vpop.f32.mrf.mxu1 }
  0xaf   :  { %855 = vmatmul.msk.bf16.gmra.mxu0 %vm264_vm2, %v250_v55 }
 0x10c   :  { %v286_v57 = vpop.f32.mrf.mxu0 }
 0x10d   :  { %v287_v58 = vadd.f32 %v286_v57, %v1088_v56 }
 0x10f   :  { %v306_v59 = vsub.f32 0.0, %v287_v58 }
 0x111   :  { %v307_v60 = vmul.f32 1.442695, %v306_v59 }
 0x112   :  { %v210_v47 = vpop.f32.mrf.mxu2 }
 0x113   :  { %925 = vpow2.f32 %v307_v60  ;;  %v246_v48 = vmax.f32 %v210_v47, 0.0 }
 0x114   :  { %v288_v16 = vpop.f32.mrf.mxu0 }
 0x115   :  { %v289_v17 = vadd.f32 %v288_v16, %v1088_v56 }
 0x117   :  { %v236_v49 = vpop.f32.mrf.mxu3 }
 0x118   :  { %v247_v50 = vmax.f32 %v236_v49, 0.0 }
 0x119   :  { %v926_v61 = vpop.eup %925 }
 0x11a   :  { %v309_v62 = vadd.f32 1.0, %v926_v61  ;;  %v212_v51 = vpop.f32.mrf.mxu2  ;;  %v251_v52 = vpack.c.bf16 %v247_v50, %v246_v48 }
 0x11c   :  { %927 = vrcp.f32 %v309_v62  ;;  %856 = vmatmul.msk.bf16.gmra.mxu0 %vm264_vm2, %v251_v52 }
 0x11f   :  { %v238_v53 = vpop.f32.mrf.mxu3 }
 0x122   :  { %v928_v0 = vpop.eup %927 }
 0x123   :  { %v311_v1 = vmul.f32 %v928_v0, %v921_v63  ;;  %v318_v7 = vsub.f32 1.0, %v928_v0 }
 0x125   :  { %313 = vrot.lane.b32.xlu0 %v311_v1, %s1003_s17 }
 0x197   :  { %v314_v2 = vpop.permute.xlu0 %313 }
 0x198   :  { %v316_v3 = vadd.f32 %v314_v2, %v287_v58  ;;  %v291_v58 = vpop.f32.mrf.mxu0 }
 0x199   :  { %v292_v59 = vadd.f32 %v291_v58, %v1088_v56 }
 0x19a   :  { %929 = vtanh.f32 %v316_v3 }
 0x1a0   :  { %v930_v4 = vpop.eup %929 }
 0x1a1   :  { %320 = vrot.lane.b32.xlu0 %v930_v4, %s1004_s18 }
 0x213   :  { %v321_v8 = vpop.permute.xlu0 %320 }
 0x214   :  { %v323_v9 = vmul.f32 %v321_v8, %v318_v7 }
 0x216   :  { %v324_v10 = vpack.c.bf16 %v323_v9, %v323_v9 }
 0x218   :  { %326 = vrot.lane.b32.xlu1 %v324_v10, %s1004_s18 }
 0x220   :  { %363 = vrot.lane.b32.xlu1 %v921_v63, %s1003_s17 }
 0x28a   :  { %v327_v11 = vpop.permute.xlu1 %326 }
 0x28b   :  { %865 = vmatmul.msk.bf16.vlgmr.msra.gmra.mxu1 %vm264_vm2, %v327_v11 }
 0x28c   :  { %647 = vmatpush.bf16.msra.mxu1 %v1099_v5 }
 0x290   :  { %648 = vmatpush.bf16.msra.mxu1 %v1105_v6 }
 0x292   :  { %v1115_v12 = vpop.permute.xlu1 %363 }
 0x308   :  { %v352_v13 = vpop.f32.mrf.mxu1 }
 0x309   :  { %v366_v14 = vadd.f32 %v1115_v12, %v352_v13  ;;  %v356_v18 = vadd.f32 %v352_v13, %v289_v17 }
 0x30b   :  { %368 = vrot.lane.b32.xlu2 %v366_v14, %s1003_s17  ;;  %v357_v19 = vsub.f32 0.0, %v356_v18  ;;  %v293_v18 = vpop.f32.mrf.mxu0 }
 0x30d   :  { %v358_v20 = vmul.f32 1.442695, %v357_v19  ;;  %v294_v19 = vadd.f32 %v293_v18, %v1088_v56 }
 0x30f   :  { %931 = vpow2.f32 %v358_v20 }
 0x310   :  { %v354_v15 = vpop.f32.mrf.mxu1 }
 0x313   :  { %v296_v41 = vpop.f32.mrf.mxu0 }
 0x314   :  { %v297_v42 = vadd.f32 %v296_v41, %v1088_v56 }
 0x315   :  { %v932_v21 = vpop.eup %931 }
 0x316   :  { %v360_v22 = vadd.f32 1.0, %v932_v21 }
 0x318   :  { %933 = vrcp.f32 %v360_v22 }
 0x31e   :  { %v934_v23 = vpop.eup %933 }
 0x365   :  { %v369_v24 = vpop.permute.xlu2 %368 }
 0x366   :  { %v371_v25 = vmul.f32 %v934_v23, %v369_v24 }
 0x368   :  { %373 = vrot.lane.b32.xlu2 %v371_v25, %s1003_s17 }
 0x3c2   :  { %v374_v26 = vpop.permute.xlu2 %373 }
 0x3c3   :  { %v376_v27 = vadd.f32 %v374_v26, %v289_v17 }
 0x3c5   :  { %935 = vtanh.f32 %v376_v27 }
 0x3cb   :  { %v936_v28 = vpop.eup %935 }
 0x3cc   :  { %379 = vrot.lane.b32.xlu0 %v936_v28, %s1004_s18 }
 0x43e   :  { %v380_v29 = vpop.permute.xlu0 %379 }
 0x43f   :  { %v382_v30 = vsub.f32 %v323_v9, %v380_v29 }
 0x441   :  { %v383_v31 = vmul.f32 %v934_v23, %v382_v30 }
 0x443   :  { %385 = vrot.lane.b32.xlu1 %v383_v31, %s1005_s23 }
 0x4b5   :  { %v386_v43 = vpop.permute.xlu1 %385 }
 0x4b6   :  { %v388_v44 = vadd.f32 %v936_v28, %v386_v43 }
 0x4b8   :  { %v389_v45 = vpack.c.bf16 %v388_v44, %v388_v44 }
 0x4ba   :  { %391 = vrot.lane.b32.xlu2 %v389_v45, %s1003_s17 }
 0x514   :  { %v392_v46 = vpop.permute.xlu2 %391 }
 0x515   :  { %866 = vmatmul.msk.bf16.vlgmr.msra.gmra.mxu2 %vm264_vm2, %v392_v46 }
 0x598   :  { %v405_v54 = vpop.f32.mrf.mxu2 }
 0x599   :  { %v415_v55 = vadd.f32 %v405_v54, %v1115_v12  ;;  %v409_v60 = vadd.f32 %v405_v54, %v292_v59 }
 0x59b   :  { %417 = vrot.lane.b32.xlu0 %v415_v55, %s1003_s17  ;;  %v410_v61 = vsub.f32 0.0, %v409_v60 }
 0x59d   :  { %v411_v62 = vmul.f32 1.442695, %v410_v61 }
 0x59f   :  { %937 = vpow2.f32 %v411_v62 }
 0x5a0   :  { %v407_v57 = vpop.f32.mrf.mxu2 }
 0x5a5   :  { %v938_v63 = vpop.eup %937 }
 0x5a6   :  { %v413_v0 = vadd.f32 1.0, %v938_v63 }
 0x5a8   :  { %939 = vrcp.f32 %v413_v0 }
 0x5ae   :  { %v940_v1 = vpop.eup %939 }
 0x60d   :  { %v418_v2 = vpop.permute.xlu0 %417 }
 0x60e   :  { %v420_v3 = vmul.f32 %v940_v1, %v418_v2 }
 0x610   :  { %422 = vrot.lane.b32.xlu1 %v420_v3, %s1003_s17 }
 0x682   :  { %v423_v4 = vpop.permute.xlu1 %422 }
 0x683   :  { %v425_v5 = vadd.f32 %v423_v4, %v292_v59 }
 0x685   :  { %941 = vtanh.f32 %v425_v5 }
 0x68b   :  { %v942_v6 = vpop.eup %941 }
 0x68c   :  { %v427_v7 = vsub.f32 %v388_v44, %v942_v6 }
 0x68e   :  { %429 = vrot.lane.b32.xlu2 %v427_v7, %s1004_s18 }
 0x6e8   :  { %v430_v8 = vpop.permute.xlu2 %429 }
 0x6e9   :  { %v432_v9 = vmul.f32 %v940_v1, %v430_v8  ;;  %v298_v1 = vpop.f32.mrf.mxu0 }
 0x6ea   :  { %v299_v2 = vadd.f32 %v298_v1, %v1088_v56 }
 0x6eb   :  { %434 = vrot.lane.b32.xlu0 %v432_v9, %s1005_s23 }
 0x75d   :  { %v435_v10 = vpop.permute.xlu0 %434 }
 0x75e   :  { %v437_v11 = vadd.f32 %v942_v6, %v435_v10 }
 0x760   :  { %v438_v13 = vpack.c.bf16 %v437_v11, %v437_v11 }
 0x762   :  { %440 = vrot.lane.b32.xlu1 %v438_v13, %s1003_s17 }
 0x7d4   :  { %v441_v14 = vpop.permute.xlu1 %440 }
 0x7d5   :  { %867 = vmatmul.msk.bf16.vlgmr.msrb.gmra.mxu3 %vm264_vm2, %v441_v14 }
 0x858   :  { %v454_v15 = vpop.f32.mrf.mxu3 }
 0x859   :  { %v464_v16 = vadd.f32 %v454_v15, %v1115_v12  ;;  %v458_v20 = vadd.f32 %v454_v15, %v294_v19 }
 0x85b   :  { %466 = vrot.lane.b32.xlu2 %v464_v16, %s1003_s17  ;;  %v459_v21 = vsub.f32 0.0, %v458_v20 }
 0x85d   :  { %v460_v22 = vmul.f32 1.442695, %v459_v21 }
 0x85f   :  { %943 = vpow2.f32 %v460_v22 }
 0x860   :  { %v456_v17 = vpop.f32.mrf.mxu3 }
 0x865   :  { %v944_v23 = vpop.eup %943 }
 0x866   :  { %v462_v24 = vadd.f32 1.0, %v944_v23 }
 0x868   :  { %945 = vrcp.f32 %v462_v24 }
 0x86e   :  { %v946_v25 = vpop.eup %945 }
 0x8b5   :  { %v467_v26 = vpop.permute.xlu2 %466 }
 0x8b6   :  { %v469_v27 = vmul.f32 %v946_v25, %v467_v26 }
 0x8b8   :  { %471 = vrot.lane.b32.xlu0 %v469_v27, %s1003_s17 }
 0x92a   :  { %v472_v28 = vpop.permute.xlu0 %471 }
 0x92b   :  { %v474_v29 = vadd.f32 %v472_v28, %v294_v19 }
 0x92d   :  { %947 = vtanh.f32 %v474_v29 }
 0x933   :  { %v948_v30 = vpop.eup %947 }
 0x934   :  { %v476_v31 = vsub.f32 %v437_v11, %v948_v30 }
 0x936   :  { %478 = vrot.lane.b32.xlu1 %v476_v31, %s1004_s18 }
 0x9a8   :  { %v479_v32 = vpop.permute.xlu1 %478 }
 0x9a9   :  { %v481_v33 = vmul.f32 %v946_v25, %v479_v32  ;;  %v301_v25 = vpop.f32.mrf.mxu0 }
 0x9aa   :  { %v302_v26 = vadd.f32 %v301_v25, %v1088_v56 }
 0x9ab   :  { %483 = vrot.lane.b32.xlu2 %v481_v33, %s1005_s23 }
 0xa05   :  { %v484_v34 = vpop.permute.xlu2 %483 }
 0xa06   :  { %v486_v35 = vadd.f32 %v948_v30, %v484_v34 }
 0xa08   :  { %v487_v36 = vpack.c.bf16 %v486_v35, %v486_v35 }
 0xa0a   :  { %489 = vrot.lane.b32.xlu0 %v487_v36, %s1003_s17 }
 0xa7c   :  { %v490_v37 = vpop.permute.xlu0 %489 }
 0xa7d   :  { %868 = vmatmul.msk.bf16.vlgmr.msrb.gmra.mxu1 %vm264_vm2, %v490_v37 }
 0xafa   :  { %v503_v38 = vpop.f32.mrf.mxu1 }
 0xafb   :  { %v513_v39 = vadd.f32 %v503_v38, %v1115_v12  ;;  %v507_v43 = vadd.f32 %v503_v38, %v297_v42 }
 0xafd   :  { %515 = vrot.lane.b32.xlu1 %v513_v39, %s1003_s17  ;;  %v508_v44 = vsub.f32 0.0, %v507_v43 }
 0xaff   :  { %v509_v45 = vmul.f32 1.442695, %v508_v44 }
 0xb01   :  { %949 = vpow2.f32 %v509_v45 }
 0xb02   :  { %v505_v40 = vpop.f32.mrf.mxu1 }
 0xb07   :  { %v950_v46 = vpop.eup %949 }
 0xb08   :  { %v511_v47 = vadd.f32 1.0, %v950_v46 }
 0xb0a   :  { %951 = vrcp.f32 %v511_v47 }
 0xb10   :  { %v952_v48 = vpop.eup %951 }
 0xb6f   :  { %v516_v49 = vpop.permute.xlu1 %515 }
 0xb70   :  { %v518_v50 = vmul.f32 %v952_v48, %v516_v49 }
 0xb72   :  { %520 = vrot.lane.b32.xlu2 %v518_v50, %s1003_s17 }
 0xbcc   :  { %v521_v51 = vpop.permute.xlu2 %520 }
 0xbcd   :  { %v523_v52 = vadd.f32 %v521_v51, %v297_v42 }
 0xbcf   :  { %953 = vtanh.f32 %v523_v52 }
 0xbd5   :  { %v954_v53 = vpop.eup %953 }
 0xbd6   :  { %v525_v54 = vsub.f32 %v486_v35, %v954_v53 }
 0xbd8   :  { %527 = vrot.lane.b32.xlu0 %v525_v54, %s1004_s18 }
 0xc4a   :  { %v528_v55 = vpop.permute.xlu0 %527 }
 0xc4b   :  { %v530_v57 = vmul.f32 %v952_v48, %v528_v55  ;;  %v303_v48 = vpop.f32.mrf.mxu0 }
 0xc4c   :  { %v304_v49 = vadd.f32 %v303_v48, %v1088_v56 }
 0xc4d   :  { %532 = vrot.lane.b32.xlu1 %v530_v57, %s1005_s23 }
 0xcbf   :  { %v533_v58 = vpop.permute.xlu1 %532 }
 0xcc0   :  { %v535_v59 = vadd.f32 %v954_v53, %v533_v58 }
 0xcc2   :  { %v536_v60 = vpack.c.bf16 %v535_v59, %v535_v59 }
 0xcc4   :  { %538 = vrot.lane.b32.xlu2 %v536_v60, %s1003_s17 }
 0xd1e   :  { %v539_v61 = vpop.permute.xlu2 %538 }
 0xd1f   :  { %869 = vmatmul.msk.bf16.vlgmr.msrb.gmra.mxu2 %vm264_vm2, %v539_v61 }
 0xda2   :  { %v552_v62 = vpop.f32.mrf.mxu2 }
 0xda3   :  { %v562_v63 = vadd.f32 %v552_v62, %v1115_v12  ;;  %v556_v3 = vadd.f32 %v552_v62, %v299_v2 }
 0xda5   :  { %564 = vrot.lane.b32.xlu0 %v562_v63, %s1003_s17  ;;  %v557_v4 = vsub.f32 0.0, %v556_v3  ;;  %v1006_v3 = vmov 32.0  }
 0xda7   :  { %v558_v5 = vmul.f32 1.442695, %v557_v4 }
 0xda9   :  { %955 = vpow2.f32 %v558_v5 }
 0xdaa   :  { %v554_v0 = vpop.f32.mrf.mxu2 }
 0xdaf   :  { %v956_v6 = vpop.eup %955 }
 0xdb0   :  { %v560_v7 = vadd.f32 1.0, %v956_v6 }
 0xdb2   :  { %957 = vrcp.f32 %v560_v7 }
 0xdb8   :  { %v958_v8 = vpop.eup %957 }
 0xe17   :  { %v565_v9 = vpop.permute.xlu0 %564 }
 0xe18   :  { %v567_v10 = vmul.f32 %v958_v8, %v565_v9 }
 0xe1a   :  { %569 = vrot.lane.b32.xlu1 %v567_v10, %s1003_s17 }
 0xe8c   :  { %v570_v11 = vpop.permute.xlu1 %569 }
 0xe8d   :  { %v572_v13 = vadd.f32 %v570_v11, %v299_v2 }
 0xe8f   :  { %959 = vtanh.f32 %v572_v13 }
 0xe95   :  { %v960_v14 = vpop.eup %959 }
 0xe96   :  { %v574_v15 = vsub.f32 %v535_v59, %v960_v14 }
 0xe98   :  { %576 = vrot.lane.b32.xlu2 %v574_v15, %s1004_s18  ;;  %v922_v15 = vld [vmem:[%s1244_s2 + $0x9] ss:$0 sm:$0xff] }
 0xef2   :  { %v577_v16 = vpop.permute.xlu2 %576 }
 0xef3   :  { %v579_v17 = vmul.f32 %v958_v8, %v577_v16  ;;  %v923_v16 = vld [vmem:[%s1244_s2 + $0xa] ss:$0 sm:$0xff] }
 0xef5   :  { %581 = vrot.lane.b32.xlu0 %v579_v17, %s1005_s23 }
 0xf67   :  { %v582_v18 = vpop.permute.xlu0 %581 }
 0xf68   :  { %v584_v19 = vadd.f32 %v960_v14, %v582_v18 }
 0xf6a   :  { %v585_v20 = vpack.c.bf16 %v584_v19, %v584_v19 }
 0xf6c   :  { %587 = vrot.lane.b32.xlu1 %v585_v20, %s1003_s17 }
 0xfde   :  { %v588_v21 = vpop.permute.xlu1 %587 }
 0xfdf   :  { %870 = vmatmul.msk.bf16.vlgmr.msra.gmra.mxu3 %vm264_vm2, %v588_v21 }
0x1062   :  { %v601_v22 = vpop.f32.mrf.mxu3 }
0x1063   :  { %v611_v23 = vadd.f32 %v601_v22, %v1115_v12  ;;  %v605_v27 = vadd.f32 %v601_v22, %v302_v26 }
0x1065   :  { %613 = vrot.lane.b32.xlu2 %v611_v23, %s1003_s17  ;;  %v606_v28 = vsub.f32 0.0, %v605_v27  ;;  %v914_v27 = vld [vmem:[%s1243_s1 + $0x60] sm:$0xff] }
0x1067   :  { %v607_v29 = vmul.f32 1.442695, %v606_v28 }
0x1069   :  { %961 = vpow2.f32 %v607_v29 }
0x106a   :  { %v603_v24 = vpop.f32.mrf.mxu3 }
0x106b   :  { %v915_v24 = vld [vmem:[%s1243_s1 + $0x68] sm:$0xff] }
0x106c   :  { %806 = vmatpush.bf16.msra.mxu2 %v915_v24 }
0x106f   :  { %v962_v30 = vpop.eup %961 }
0x1070   :  { %v609_v31 = vadd.f32 1.0, %v962_v30  ;;  %807 = vmatpush.bf16.msra.mxu2 %v914_v27  ;;  %v913_v30 = vld [vmem:[%s1243_s1 + $0x58] sm:$0xff] }
0x1072   :  { %963 = vrcp.f32 %v609_v31 }
0x1074   :  { %808 = vmatpush.bf16.msra.mxu2 %v913_v30 }
0x1078   :  { %v964_v32 = vpop.eup %963 }
0x10bf   :  { %v614_v33 = vpop.permute.xlu2 %613 }
0x10c0   :  { %v616_v34 = vmul.f32 %v964_v32, %v614_v33 }
0x10c2   :  { %618 = vrot.lane.b32.xlu0 %v616_v34, %s1003_s17 }
0x1134   :  { %v619_v35 = vpop.permute.xlu0 %618 }
0x1135   :  { %v621_v36 = vadd.f32 %v619_v35, %v302_v26 }
0x1137   :  { %965 = vtanh.f32 %v621_v36 }
0x113d   :  { %v966_v37 = vpop.eup %965 }
0x113e   :  { %v623_v38 = vsub.f32 %v584_v19, %v966_v37 }
0x1140   :  { %625 = vrot.lane.b32.xlu1 %v623_v38, %s1004_s18 }
0x11b2   :  { %v626_v39 = vpop.permute.xlu1 %625 }
0x11b3   :  { %v628_v40 = vmul.f32 %v964_v32, %v626_v39  ;;  %v912_v39 = vld [vmem:[%s1243_s1 + $0x50] sm:$0xff] }
0x11b4   :  { %809 = vmatpush.bf16.msra.mxu2 %v912_v39 }
0x11b5   :  { %630 = vrot.lane.b32.xlu2 %v628_v40, %s1005_s23  ;;  %v911_v40 = vld [vmem:[%s1243_s1 + $0x48] sm:$0xff] }
0x11b8   :  { %810 = vmatpush.bf16.msra.mxu2 %v911_v40 }
0x120f   :  { %v631_v41 = vpop.permute.xlu2 %630 }
0x1210   :  { %v633_v42 = vadd.f32 %v966_v37, %v631_v41  ;;  %v910_v41 = vld [vmem:[%s1243_s1 + $0x40] sm:$0xff] }
0x1211   :  { %811 = vmatpush.bf16.msra.mxu2 %v910_v41 }
0x1212   :  { %v634_v43 = vpack.c.bf16 %v633_v42, %v633_v42 }
0x1214   :  { %636 = vrot.lane.b32.xlu0 %v634_v43, %s1003_s17  ;;  %v908_v43 = vld [vmem:[%s1243_s1 + $0x30] sm:$0xff] }
0x1286   :  { %v637_v44 = vpop.permute.xlu0 %636 }
0x1287   :  { %871 = vmatmul.msk.bf16.vlgmr.msra.gmra.mxu1 %vm264_vm2, %v637_v44 }
0x1304   :  { %v650_v45 = vpop.f32.mrf.mxu1 }
0x1305   :  { %v660_v46 = vadd.f32 %v650_v45, %v1115_v12  ;;  %v654_v50 = vadd.f32 %v650_v45, %v304_v49 }
0x1307   :  { %662 = vrot.lane.b32.xlu1 %v660_v46, %s1003_s17  ;;  %v655_v51 = vsub.f32 0.0, %v654_v50 }
0x1309   :  { %v656_v52 = vmul.f32 1.442695, %v655_v51 }
0x130b   :  { %967 = vpow2.f32 %v656_v52 }
0x130c   :  { %v652_v47 = vpop.f32.mrf.mxu1 }
0x1311   :  { %v968_v53 = vpop.eup %967 }
0x1312   :  { %v658_v54 = vadd.f32 1.0, %v968_v53 }
0x1314   :  { %969 = vrcp.f32 %v658_v54  ;;  %v924_v54 = vld [vmem:[%s1244_s2 + $0xb] ss:$0 sm:$0xff] }
0x131a   :  { %v970_v55 = vpop.eup %969 }
0x1379   :  { %v663_v57 = vpop.permute.xlu1 %662 }
0x137a   :  { %v665_v58 = vmul.f32 %v970_v55, %v663_v57 }
0x137c   :  { %667 = vrot.lane.b32.xlu2 %v665_v58, %s1003_s17 }
0x13d6   :  { %v668_v59 = vpop.permute.xlu2 %667 }
0x13d7   :  { %v670_v12 = vadd.f32 %v668_v59, %v304_v49 }
0x13d9   :  { %971 = vtanh.f32 %v670_v12 }
0x13da   :  { %973 = vrcp.f32 %v1006_v3 }
0x13df   :  { %v972_v60 = vpop.eup %971 }
0x13e0   :  { %v672_v61 = vsub.f32 %v633_v42, %v972_v60  ;;  %v974_v4 = vpop.eup %973  ;;  %v909_v42 = vld [vmem:[%s1243_s1 + $0x38] sm:$0xff]  ;;  %s1007_s1 = smov [#allocation2]  }
0x13e1   :  { %v691_v5 = vmul.f32 32.0, %v974_v4  ;;  %vm695_vm3 = vweird.f32 %v974_v4  ;;  %812 = vmatpush.bf16.msra.mxu2 %v909_v42  ;;  %s826_s26 = sshll.u32 %s1007_s1, 4  ;;  %s827_s26 = int_to_ptr.vmem [resolvable:$true] %s826_s26 }
0x13e2   :  { %674 = vrot.lane.b32.xlu0 %v672_v61, %s1004_s18 }
0x13e3   :  { %v692_v6 = vsub.f32 1.0, %v691_v5 }
0x13e5   :  { %v693_v7 = vmul.f32 %v974_v4, %v692_v6  ;;  %813 = vmatpush.bf16.msra.mxu2 %v908_v43 }
0x13e7   :  { %v694_v8 = vadd.f32 %v974_v4, %v693_v7 }
0x13e9   :  { %v696_v9 = vsel %vm695_vm3, %v974_v4, %v694_v8 }
0x1454   :  { %v675_v56 = vpop.permute.xlu0 %674 }
0x1455   :  { %v677_v62 = vmul.f32 %v970_v55, %v675_v56 }
0x1457   :  { %679 = vrot.lane.b32.xlu1 %v677_v62, %s1005_s23 }
0x14c9   :  { %v680_v63 = vpop.permute.xlu1 %679 }
0x14ca   :  { %v682_v0 = vadd.f32 %v972_v60, %v680_v63 }
0x14cc   :  { %684 = vrot.lane.b32.xlu2 %v682_v0, %s1003_s17 }
0x1526   :  { %v685_v1 = vpop.permute.xlu2 %684 }
0x1527   :  { %v687_v2 = vsel %vm264_vm2, %v685_v1, 0.0 }
0x1528   :  { %688 = vadd.xlane.f32.xlu0 %v687_v2 }
0x159b   :  { %v689_v10 = vpop.xlane.xlu0 %688 }
0x159c   :  { %v697_v11 = vmul.f32 %v696_v9, %v689_v10 }
0x159e   :  { %v698_v13 = vsub.f32 %v682_v0, %v697_v11 }
0x15a0   :  { %v699_v14 = vmul.f32 %v698_v13, %v698_v13 }
0x15a2   :  { %701 = vrot.lane.b32.xlu1 %v699_v14, %s1003_s17 }
0x15aa   :  { %722 = vrot.lane.b32.xlu1 %v922_v15, %s1003_s17 }
0x15b2   :  { %728 = vrot.lane.b32.xlu1 %v923_v16, %s1003_s17 }
0x1614   :  { %v702_v17 = vpop.permute.xlu1 %701 }
0x1615   :  { %v704_v18 = vsel %vm264_vm2, %v702_v17, 0.0 }
0x1616   :  { %705 = vadd.xlane.f32.xlu2 %v704_v18 }
0x161c   :  { %v723_v26 = vpop.permute.xlu1 %722 }
0x1624   :  { %v729_v34 = vpop.permute.xlu1 %728 }
0x1689   :  { %v706_v19 = vpop.xlane.xlu2 %705 }
0x168a   :  { %v707_v20 = vmul.f32 %v706_v19, %v696_v9 }
0x168c   :  { %v708_v21 = vadd.f32 1e-06, %v707_v20 }
0x168e   :  { %975 = vrsqrt.f32 %v708_v21  ;;  %vm715_vm5 = vweird.f32 %v708_v21 }
0x1694   :  { %v976_v22 = vpop.eup %975 }
0x1695   :  { %v710_v23 = vmul.f32 %v976_v22, %v708_v21  ;;  %vm716_vm4 = vweird.f32 %v976_v22 }
0x1696   :  { %vm717_vm6 = vmor %vm715_vm5, %vm716_vm4 }
0x1697   :  { %v711_v25 = vmul.f32 %v976_v22, %v710_v23 }
0x1699   :  { %v712_v28 = vmul.f32 0.5, %v711_v25 }
0x169b   :  { %v713_v29 = vsub.f32 1.5, %v712_v28 }
0x169d   :  { %v714_v31 = vmul.f32 %v976_v22, %v713_v29 }
0x169f   :  { %v718_v32 = vsel %vm717_vm6, %v976_v22, %v714_v31 }
0x16a0   :  { %v719_v33 = vmul.f32 %v718_v32, %v698_v13 }
0x16a2   :  { %v725_v35 = vmul.f32 %v723_v26, %v719_v33 }
0x16a4   :  { %v731_v36 = vadd.f32 %v729_v34, %v725_v35 }
0x16a6   :  { %733 = vrot.lane.b32.xlu1 %v731_v36, %s1003_s17  ;;  %v736_v37 = vrot.slane %v731_v36, 1  ;;  %v742_v38 = vrot.slane %v731_v36, 3  ;;  %v740_v47 = vrot.slane %v731_v36, 2 }
0x16ae   :  { %737 = vrot.lane.b32.xlu1 %v736_v37, %s1004_s18 }
0x16b6   :  { %743 = vrot.lane.b32.xlu1 %v742_v38, %s1005_s23 }
0x1718   :  { %v734_v44 = vpop.permute.xlu1 %733 }
0x1720   :  { %v738_v45 = vpop.permute.xlu1 %737 }
0x1721   :  { %v746_v46 = vsel %vm264_vm2, %v734_v44, %v738_v45 }
0x1722   :  { %v748_v48 = vsel %vm747_vm7, %v746_v46, %v740_v47 }
0x1728   :  { %v744_v49 = vpop.permute.xlu1 %743 }
0x1729   :  { %v750_v50 = vsel %vm749_vm8, %v748_v48, %v744_v49 }
0x172a   :  { %v752_v51 = vrot.slane %v750_v50, 3 }
0x172c   :  { %v755_v52 = vsel %vm754_vm9, %v750_v50, %v752_v51 }
0x172d   :  { %v756_v53 = vpack.c.bf16 %v755_v52, %v755_v52 }
0x172f   :  { %814 = vmatmul.bf16.vlgmr.msra.gmra.mxu2 %v756_v53 }
0x17b2   :  { %v815_v55 = vpop.f32.mrf.mxu2 }
0x17b3   :  { %v816_v57 = vadd.f32 %v924_v54, %v815_v55 }
0x17b5   :  { %820 = vst.msk [vmem:[#allocation2] sm:$0x3] %vm819_vm10, %v816_v57 }
0x17b6   :  { %831 = dma.vmem_to_hbm [thread:$0]  %s827_s26, 32, %s829_s29, [#allocation3]  }
0x17ba   :  { %v817_v58 = vpop.f32.mrf.mxu2 }
0x17bb   :  { %1001 = dma.done.wait [#allocation3], 32  }
0x17bc   :  { %1002 = vsyncadd [#allocation3], 4294967264 }
0x17bd   :  { %836 = vsyncpa [#allocation3], 1 }

</bundles_post_ra>
